<compile_context>
chip_gen: v7x
topology: tpu7x:2x2x1
jax: 0.10.0
libtpu: 0.0.40
codegen_flags: <defaults>
</compile_context>

<pallas_src>
import functools

import jax
import jax.numpy as jnp
import numpy as np
from jax import lax
from jax.experimental import pallas as pl
from jax.experimental.pallas import tpu as pltpu


def plucker_bias_kernel(scale_ref, q_ref, k_ref, o_ref, *, eps):
    # scale_ref : VMEM (W, 1, 1)   per-weight scale (= -w^2)
    # q_ref     : VMEM (1, tq, 13) augmented query-ray features
    # k_ref     : VMEM (1, 16, tk) augmented key-ray features (lane-dense)
    # o_ref     : VMEM (W, 1, tq, tk) scaled pairwise Plucker-distance bias
    q = q_ref[0]            # (tq, 13)
    k = k_ref[0]            # (16, tk)

    # Query columns: [d.m | d(3) | m(3) | |d|^2|m|^2 | |d|^2 | |d|^2*m(3) | 1/max(|d|^2,eps)]
    d_q    = q[:, 1:4]      # (tq, 3)
    lhs_r  = q[:, 1:7]      # (tq, 6)  [d_q | m_q]
    lhs_p  = q[:, 0:4]      # (tq, 4)  [d_q.m_q | d_q]
    lhs_e  = q[:, 7:12]     # (tq, 5)  [|d_q|^2|m_q|^2 | |d_q|^2 | |d_q|^2 m_q]
    nq_d2  = q[:, 8:9]      # (tq, 1)
    inv_nq = q[:, 12:13]    # (tq, 1)  1 / max(|d_q|^2, eps)

    # Key rows: [m_k(3) | d_k(3) | 1 | -m_k(3) | 1 | |m_k|^2 | -2*m_k(3) | |d_k|^2]
    rhs_d = k[3:6, :]       # d_k
    rhs_r = k[0:6, :]       # [m_k ; d_k]
    rhs_p = k[6:10, :]      # [1 ; -m_k]
    rhs_e = k[10:15, :]     # [1 ; |m_k|^2 ; -2 m_k]
    nk_d2 = k[15:16, :]     # (1, tk)

    # Pairwise terms on the MXU (contraction depth 3..6 of 256 -> huge slack).
    dq_dk    = jnp.dot(d_q,   rhs_d, preferred_element_type=jnp.float32)  # d_q.d_k
    recip    = jnp.dot(lhs_r, rhs_r, preferred_element_type=jnp.float32)  # d_q.m_k + m_q.d_k
    dq_diff  = jnp.dot(lhs_p, rhs_p, preferred_element_type=jnp.float32)  # d_q.(m_q - m_k)
    nq_diff2 = jnp.dot(lhs_e, rhs_e, preferred_element_type=jnp.float32)  # |d_q|^2 |m_q - m_k|^2

    eps_sq = eps * eps
    # ||d_q x d_k||^2 via Lagrange identity; outer product is a cheap (tq,1)x(1,tk) broadcast.
    cross_sq = nq_d2 * nk_d2 - dq_dk * dq_dk
    # Skew-line distance: |recip| / max(||d_q x d_k||, eps)
    dist_skew = jnp.abs(recip) * lax.rsqrt(jnp.maximum(cross_sq, eps_sq))
    # Parallel-line fallback: ||d_q x (m_q - m_k)|| / max(||d_q||^2, eps)
    par_sq = jnp.maximum(nq_diff2 - dq_diff * dq_diff, 0.0)
    dist_par = jnp.sqrt(par_sq) * inv_nq
    dist = jnp.where(cross_sq < eps_sq, dist_par, dist_skew)

    # Fold the -(w^2) scale and the W axis into the kernel store (no extra HBM pass).
    for wi in range(o_ref.shape[0]):
        o_ref[wi, 0] = (scale_ref[wi] * dist).astype(o_ref.dtype)


def _round_up(x, m):
    return ((x + m - 1) // m) * m


def plucker_bias_pallas(ray_q, ray_k, scale, *, eps, tq_max=512, tk_max=1024,
                        out_dtype=jnp.float32):
    """bias[w, b, i, j] = scale[w] * plucker_dist(ray_q[b, i], ray_k[b, j])."""
    ray_q = ray_q.astype(jnp.float32)
    ray_k = ray_k.astype(jnp.float32)
    scale = scale.astype(jnp.float32)
    B, Q, _ = ray_q.shape
    _, K, _ = ray_k.shape
    W = int(scale.shape[0])
    eps = float(eps)

    # --- Per-ray augmented features (O(Q+K) wrapper work; kernel then only does
    #     O(Q*K) work with the broadcast terms pre-folded into MXU operands). ---
    d_q, m_q = ray_q[..., 0:3], ray_q[..., 3:6]
    nq_d2 = jnp.sum(d_q * d_q, axis=-1, keepdims=True)
    nq_m2 = jnp.sum(m_q * m_q, axis=-1, keepdims=True)
    dq_mq = jnp.sum(d_q * m_q, axis=-1, keepdims=True)
    inv_nq = 1.0 / jnp.maximum(nq_d2, eps)
    q_aug = jnp.concatenate(
        [dq_mq, d_q, m_q, nq_d2 * nq_m2, nq_d2, nq_d2 * m_q, inv_nq], axis=-1)   # (B, Q, 13)

    d_k, m_k = ray_k[..., 0:3], ray_k[..., 3:6]
    nk_d2 = jnp.sum(d_k * d_k, axis=-1, keepdims=True)
    nk_m2 = jnp.sum(m_k * m_k, axis=-1, keepdims=True)
    ones_k = jnp.ones_like(nk_d2)
    k_feat = jnp.concatenate(
        [m_k, d_k, ones_k, -m_k, ones_k, nk_m2, -2.0 * m_k, nk_d2], axis=-1)     # (B, K, 16)
    k_aug = jnp.swapaxes(k_feat, 1, 2)                                           # (B, 16, K)
    CQ = q_aug.shape[-1]
    CK = k_aug.shape[1]

    # --- Tiling: sublane-pad Q, lane-pad K (multiple of 128 -> unmasked stores). ---
    Qp = _round_up(Q, 8)
    Kp = _round_up(K, 128)
    tq = min(tq_max, Qp)
    Qp = _round_up(Qp, tq)
    tk = min(tk_max, Kp)
    Kp = _round_up(Kp, tk)
    # Dual-TensorCore parts (v7x): make sure there are >= 2 grid steps even at B=1.
    while (B * (Qp // tq) * (Kp // tk) < 2) and tq % 16 == 0 and Qp % (tq // 2) == 0:
        tq //= 2

    if Qp != Q:
        q_aug = jnp.pad(q_aug, ((0, 0), (0, Qp - Q), (0, 0)))
    if Kp != K:
        k_aug = jnp.pad(k_aug, ((0, 0), (0, 0), (0, Kp - K)))

    kernel = functools.partial(plucker_bias_kernel, eps=eps)
    out = pl.pallas_call(
        kernel,
        out_shape=jax.ShapeDtypeStruct((W, B, Qp, Kp), out_dtype),
        grid=(B, Qp // tq, Kp // tk),
        in_specs=[
            pl.BlockSpec((W, 1, 1), lambda b, qi, ki: (0, 0, 0)),      # scale (fetched once)
            pl.BlockSpec((1, tq, CQ), lambda b, qi, ki: (b, qi, 0)),   # query features
            pl.BlockSpec((1, CK, tk), lambda b, qi, ki: (b, 0, ki)),   # key features
        ],
        out_specs=pl.BlockSpec((W, 1, tq, tk), lambda b, qi, ki: (0, b, qi, ki)),
        compiler_params=pltpu.CompilerParams(
            dimension_semantics=("parallel", "parallel", "parallel"),
            # 48 MiB: fits ~512x1024 f32 tiles (+ W-deep output double-buffer)
            # and stays inside v7x's 64 MiB physical VMEM per TensorCore.
            vmem_limit_bytes=48 * 1024 * 1024,
        ),
    )(scale.reshape(W, 1, 1), q_aug, k_aug)

    # No-op when Q / K are already (8,128)-aligned; otherwise strips the padding.
    return out[:, :, :Q, :K]


def geometry_module_forward(ray_q, ray_k, geometric_weight, *, eps,
                            num_heads=None, materialize_heads=False,
                            out_dtype=jnp.float32):
    """GeometryModule.forward.

    Returns (for W = len(geometric_weight)):
      * materialize_heads=True : exact torch semantics, (W, B*H, Q, K)
        (repeat_interleave over heads), squeezed to (B*H, Q, K) if W == 1.
      * default                : head-broadcastable bias (W, B, 1, Q, K)
        (same values for every head; consumer broadcasts over the head axis).
    """
    w = geometric_weight.astype(jnp.float32)
    scale = -(w * w)                                                   # (W,)
    bias = plucker_bias_pallas(ray_q, ray_k, scale, eps=eps,
                               out_dtype=out_dtype)                    # (W, B, Q, K)

    if num_heads is not None:
        if materialize_heads:
            bias = jnp.repeat(bias, num_heads, axis=1)                 # (W, B*H, Q, K)
        else:
            bias = bias[:, :, None]                                    # (W, B, 1, Q, K)
    if geometric_weight.shape[0] == 1:
        bias = bias[0]
    return bias


def geometry_module_reference(ray_q, ray_k, geometric_weight, *, eps, num_heads=None):
    """Pure-JAX reference (mirrors the PyTorch forward semantics)."""
    d_q, m_q = ray_q[..., :3], ray_q[..., 3:]
    d_k, m_k = ray_k[..., :3], ray_k[..., 3:]
    d_q_e, m_q_e = d_q[:, :, None, :], m_q[:, :, None, :]
    d_k_e, m_k_e = d_k[:, None, :, :], m_k[:, None, :, :]

    recip = jnp.abs(jnp.sum(d_q_e * m_k_e + m_q_e * d_k_e, axis=-1))
    cross = jnp.cross(d_q_e, d_k_e)
    cn = jnp.linalg.norm(cross, axis=-1)
    dist_skew = recip / jnp.maximum(cn, eps)

    par_cross = jnp.cross(jnp.broadcast_to(d_q_e, recip.shape + (3,)), m_q_e - m_k_e)
    nq_d2 = jnp.sum(d_q_e * d_q_e, axis=-1)
    dist_par = jnp.linalg.norm(par_cross, axis=-1) / jnp.maximum(nq_d2, eps)

    dists = jnp.where(cn < eps, dist_par, dist_skew)
    if num_heads is not None:
        dists = jnp.repeat(dists, num_heads, axis=0)
    out = jnp.stack([-(w ** 2) * dists for w in geometric_weight], axis=0)
    if geometric_weight.shape[0] == 1:
        out = out[0]
    return out


if __name__ == "__main__":
    key = jax.random.PRNGKey(0)
    B, Q, K, H = 2, 8, 8, 4
    kq_o, kq_d, kk_o, kk_d = jax.random.split(key, 4)

    def make_rays(ko, kd, n):
        origin = jax.random.normal(ko, (B, n, 3), jnp.float32)
        direction = jax.random.normal(kd, (B, n, 3), jnp.float32)
        direction = direction / jnp.linalg.norm(direction, axis=-1, keepdims=True)
        moment = jnp.cross(origin, direction)
        return jnp.concatenate([direction, moment], axis=-1)     # (B, n, 6)

    ray_q = make_rays(kq_o, kq_d, Q)
    ray_k = make_rays(kk_o, kk_d, K)

    geometric_weight = jnp.array([0.5, 1.5], dtype=jnp.float32)
    W = int(geometric_weight.shape[0])
    eps = 1e-6

    # Exact torch-equivalent output (heads materialized) for validation.
    out = geometry_module_forward(ray_q, ray_k, geometric_weight, eps=eps,
                                  num_heads=H, materialize_heads=True)
    out = jax.block_until_ready(out)
    ref = geometry_module_reference(ray_q, ray_k, geometric_weight, eps=eps, num_heads=H)
    assert out.shape == (W, B * H, Q, K), out.shape
    np.testing.assert_allclose(np.asarray(out), np.asarray(ref), rtol=1e-4, atol=1e-4)

    # Default head-broadcastable output carries identical information.
    out_bcast = geometry_module_forward(ray_q, ray_k, geometric_weight, eps=eps,
                                        num_heads=H)
    out_bcast = jax.block_until_ready(out_bcast)
    assert out_bcast.shape == (W, B, 1, Q, K), out_bcast.shape
    expanded = jnp.broadcast_to(out_bcast, (W, B, H, Q, K)).reshape(W, B * H, Q, K)
    np.testing.assert_allclose(np.asarray(expanded), np.asarray(out), rtol=0, atol=0)

    print("KERNEL_OK")
</pallas_src>

<mosaic_0001>
module attributes {stable_mosaic.version = 11 : i64} {
  func.func @plucker_bias_kernel(%arg0: i32, %arg1: i32, %arg2: i32, %arg3: memref<2x1x1xf32, #tpu.memory_space<vmem>>, %arg4: memref<1x8x13xf32, #tpu.memory_space<vmem>>, %arg5: memref<1x16x128xf32, #tpu.memory_space<vmem>>, %arg6: memref<2x1x8x128xf32, #tpu.memory_space<vmem>>) attributes {dimension_semantics = [#tpu.dimension_semantics<parallel>, #tpu.dimension_semantics<parallel>, #tpu.dimension_semantics<parallel>], iteration_bounds = array<i64: 2, 1, 1>, scalar_prefetch = 0 : i64, scratch_operands = 0 : i64, tpu.core_type = #tpu.core_type<tc>, window_params = [{pipeline_mode = #tpu.pipeline_mode<synchronous>, transform_indices = @transform_0, window_bounds = array<i64: 2, 1, 1>}, {transform_indices = @transform_1, window_bounds = array<i64: 1, 8, 13>}, {transform_indices = @transform_2, window_bounds = array<i64: 1, 16, 128>}, {transform_indices = @transform_3, window_bounds = array<i64: 2, 1, 8, 128>}]} {
    %c0 = arith.constant 0 : index
    %c0_0 = arith.constant 0 : index
    %c0_1 = arith.constant 0 : index
    %0 = vector.load %arg4[%c0, %c0_0, %c0_1] : memref<1x8x13xf32, #tpu.memory_space<vmem>>, vector<1x8x13xf32>
    %1 = vector.shape_cast %0 : vector<1x8x13xf32> to vector<8x13xf32>
    %c0_2 = arith.constant 0 : index
    %c0_3 = arith.constant 0 : index
    %c0_4 = arith.constant 0 : index
    %2 = vector.load %arg5[%c0_2, %c0_3, %c0_4] : memref<1x16x128xf32, #tpu.memory_space<vmem>>, vector<1x16x128xf32>
    %3 = vector.shape_cast %2 : vector<1x16x128xf32> to vector<16x128xf32>
    %4 = vector.extract_strided_slice %1 {offsets = [0, 1], sizes = [8, 3], strides = [1, 1]} : vector<8x13xf32> to vector<8x3xf32>
    %5 = vector.extract_strided_slice %1 {offsets = [0, 1], sizes = [8, 6], strides = [1, 1]} : vector<8x13xf32> to vector<8x6xf32>
    %6 = vector.extract_strided_slice %1 {offsets = [0, 0], sizes = [8, 4], strides = [1, 1]} : vector<8x13xf32> to vector<8x4xf32>
    %7 = vector.extract_strided_slice %1 {offsets = [0, 7], sizes = [8, 5], strides = [1, 1]} : vector<8x13xf32> to vector<8x5xf32>
    %8 = vector.extract_strided_slice %1 {offsets = [0, 8], sizes = [8, 1], strides = [1, 1]} : vector<8x13xf32> to vector<8x1xf32>
    %9 = vector.extract_strided_slice %1 {offsets = [0, 12], sizes = [8, 1], strides = [1, 1]} : vector<8x13xf32> to vector<8x1xf32>
    %10 = vector.extract_strided_slice %3 {offsets = [3, 0], sizes = [3, 128], strides = [1, 1]} : vector<16x128xf32> to vector<3x128xf32>
    %11 = vector.extract_strided_slice %3 {offsets = [0, 0], sizes = [6, 128], strides = [1, 1]} : vector<16x128xf32> to vector<6x128xf32>
    %12 = vector.extract_strided_slice %3 {offsets = [6, 0], sizes = [4, 128], strides = [1, 1]} : vector<16x128xf32> to vector<4x128xf32>
    %13 = vector.extract_strided_slice %3 {offsets = [10, 0], sizes = [5, 128], strides = [1, 1]} : vector<16x128xf32> to vector<5x128xf32>
    %14 = vector.extract_strided_slice %3 {offsets = [15, 0], sizes = [1, 128], strides = [1, 1]} : vector<16x128xf32> to vector<1x128xf32>
    %cst = arith.constant dense<0.000000e+00> : vector<8x128xf32>
    %15 = tpu.matmul %4, %10, %cst {dimension_numbers = #tpu.dot_dimension_numbers<[1], [0], [0], [1], [0, 0, 1, 1], [], []>} : vector<8x3xf32>, vector<3x128xf32>, vector<8x128xf32> -> vector<8x128xf32>
    %cst_5 = arith.constant dense<0.000000e+00> : vector<8x128xf32>
    %16 = tpu.matmul %5, %11, %cst_5 {dimension_numbers = #tpu.dot_dimension_numbers<[1], [0], [0], [1], [0, 0, 1, 1], [], []>} : vector<8x6xf32>, vector<6x128xf32>, vector<8x128xf32> -> vector<8x128xf32>
    %cst_6 = arith.constant dense<0.000000e+00> : vector<8x128xf32>
    %17 = tpu.matmul %6, %12, %cst_6 {dimension_numbers = #tpu.dot_dimension_numbers<[1], [0], [0], [1], [0, 0, 1, 1], [], []>} : vector<8x4xf32>, vector<4x128xf32>, vector<8x128xf32> -> vector<8x128xf32>
    %cst_7 = arith.constant dense<0.000000e+00> : vector<8x128xf32>
    %18 = tpu.matmul %7, %13, %cst_7 {dimension_numbers = #tpu.dot_dimension_numbers<[1], [0], [0], [1], [0, 0, 1, 1], [], []>} : vector<8x5xf32>, vector<5x128xf32>, vector<8x128xf32> -> vector<8x128xf32>
    %19 = vector.broadcast %8 : vector<8x1xf32> to vector<8x128xf32>
    %20 = vector.broadcast %14 : vector<1x128xf32> to vector<8x128xf32>
    %21 = arith.mulf %19, %20 : vector<8x128xf32>
    %22 = arith.mulf %15, %15 : vector<8x128xf32>
    %23 = arith.subf %21, %22 : vector<8x128xf32>
    %24 = math.absf %16 : vector<8x128xf32>
    %cst_8 = arith.constant 9.99999996E-13 : f32
    %25 = vector.broadcast %cst_8 : f32 to vector<8x128xf32>
    %26 = arith.maximumf %23, %25 : vector<8x128xf32>
    %27 = math.rsqrt %26 : vector<8x128xf32>
    %28 = arith.mulf %24, %27 : vector<8x128xf32>
    %29 = arith.mulf %17, %17 : vector<8x128xf32>
    %30 = arith.subf %18, %29 : vector<8x128xf32>
    %cst_9 = arith.constant 0.000000e+00 : f32
    %31 = vector.broadcast %cst_9 : f32 to vector<8x128xf32>
    %32 = arith.maximumf %30, %31 : vector<8x128xf32>
    %33 = math.sqrt %32 : vector<8x128xf32>
    %34 = vector.broadcast %9 : vector<8x1xf32> to vector<8x128xf32>
    %35 = arith.mulf %33, %34 : vector<8x128xf32>
    %cst_10 = arith.constant 9.99999996E-13 : f32
    %36 = vector.broadcast %cst_10 : f32 to vector<8x128xf32>
    %37 = arith.cmpf olt, %23, %36 : vector<8x128xf32>
    %38 = arith.select %37, %35, %28 : vector<8x128xi1>, vector<8x128xf32>
    %c0_11 = arith.constant 0 : index
    %c0_12 = arith.constant 0 : index
    %c0_13 = arith.constant 0 : index
    %39 = vector.load %arg3[%c0_11, %c0_12, %c0_13] : memref<2x1x1xf32, #tpu.memory_space<vmem>>, vector<1x1x1xf32>
    %40 = vector.shape_cast %39 : vector<1x1x1xf32> to vector<1x1xf32>
    %41 = vector.broadcast %40 : vector<1x1xf32> to vector<8x128xf32>
    %42 = arith.mulf %41, %38 : vector<8x128xf32>
    %c0_14 = arith.constant 0 : index
    %c0_15 = arith.constant 0 : index
    %c0_16 = arith.constant 0 : index
    %c0_17 = arith.constant 0 : index
    %43 = vector.load %arg6[%c0_14, %c0_15, %c0_16, %c0_17] : memref<2x1x8x128xf32, #tpu.memory_space<vmem>>, vector<1x1x8x128xf32>
    %44 = vector.shape_cast %43 : vector<1x1x8x128xf32> to vector<8x128xf32>
    %45 = vector.shape_cast %42 : vector<8x128xf32> to vector<1x1x8x128xf32>
    tpu.vector_store %arg6[%c0_14, %c0_15, %c0_16, %c0_17], %45 {strides = array<i32>} : memref<2x1x8x128xf32, #tpu.memory_space<vmem>>, vector<1x1x8x128xf32>,
    %c1 = arith.constant 1 : index
    %c0_18 = arith.constant 0 : index
    %c0_19 = arith.constant 0 : index
    %46 = vector.load %arg3[%c1, %c0_18, %c0_19] : memref<2x1x1xf32, #tpu.memory_space<vmem>>, vector<1x1x1xf32>
    %47 = vector.shape_cast %46 : vector<1x1x1xf32> to vector<1x1xf32>
    %48 = vector.broadcast %47 : vector<1x1xf32> to vector<8x128xf32>
    %49 = arith.mulf %48, %38 : vector<8x128xf32>
    %c1_20 = arith.constant 1 : index
    %c0_21 = arith.constant 0 : index
    %c0_22 = arith.constant 0 : index
    %c0_23 = arith.constant 0 : index
    %50 = vector.load %arg6[%c1_20, %c0_21, %c0_22, %c0_23] : memref<2x1x8x128xf32, #tpu.memory_space<vmem>>, vector<1x1x8x128xf32>
    %51 = vector.shape_cast %50 : vector<1x1x8x128xf32> to vector<8x128xf32>
    %52 = vector.shape_cast %49 : vector<8x128xf32> to vector<1x1x8x128xf32>
    tpu.vector_store %arg6[%c1_20, %c0_21, %c0_22, %c0_23], %52 {strides = array<i32>} : memref<2x1x8x128xf32, #tpu.memory_space<vmem>>, vector<1x1x8x128xf32>,
    return
  }
  func.func @transform_0(%arg0: i32, %arg1: i32, %arg2: i32) -> (i32, i32, i32) {
    %c0_i32 = arith.constant 0 : i32
    %c0_i32_0 = arith.constant 0 : i32
    %c0_i32_1 = arith.constant 0 : i32
    %c0_i32_2 = arith.constant 0 : i32
    return %c0_i32, %c0_i32_0, %c0_i32_1 : i32, i32, i32
  }
  func.func @transform_1(%arg0: i32, %arg1: i32, %arg2: i32) -> (i32, i32, i32) {
    %c0_i32 = arith.constant 0 : i32
    %c0_i32_0 = arith.constant 0 : i32
    return %arg0, %arg1, %c0_i32 : i32, i32, i32
  }
  func.func @transform_2(%arg0: i32, %arg1: i32, %arg2: i32) -> (i32, i32, i32) {
    %c0_i32 = arith.constant 0 : i32
    %c0_i32_0 = arith.constant 0 : i32
    return %arg0, %c0_i32, %arg2 : i32, i32, i32
  }
  func.func @transform_3(%arg0: i32, %arg1: i32, %arg2: i32) -> (i32, i32, i32, i32) {
    %c0_i32 = arith.constant 0 : i32
    %c0_i32_0 = arith.constant 0 : i32
    return %c0_i32, %arg0, %arg1, %arg2 : i32, i32, i32, i32
  }
}

</mosaic_0001>

<bundles_post_ra>
// kernel: tpu_custom_call.1
= control target key start
LH: loop header
LB: loop body
LE: loop exit
PB: predicated region body
PF: predicated region fallthrough
CT: control target
= control target key end

     0   :  { %8 = vsyncpa [#allocation3], 0  ;;  %s1331_s0 = inlined_call_operand.vmem [shape: f32[2,1,1], index: 0, kind: input, shape index: {}]   ;;  %s1332_s1 = inlined_call_operand.hbm [shape: f32[2,8,13], index: 1, kind: input, shape index: {}]   ;;  %s1333_s2 = inlined_call_operand.hbm [shape: f32[2,16,128], index: 2, kind: input, shape index: {}]   ;;  %s1334_s3 = inlined_call_operand.hbm [shape: f32[2,2,8,128], index: 3, kind: output, shape index: {}]  }
   0x1   :  { %10 = vsyncpa [#allocation3 + $0x1], 0 }
   0x2   :  { %11 = vsyncpa [#allocation6], 0 }
   0x3   :  { %13 = vsyncpa [#allocation6 + $0x1], 0 }
   0x4   :  { %14 = vsyncpa [#allocation4], 0 }
   0x5   :  { %16 = vsyncpa [#allocation4 + $0x1], 0  ;;  %s1088_s12 = smov 0   ;;  %s1090_s13 = smov 0  }
   0x6   :  { %s1092_s14 = smov 0   ;;  %s1094_s15 = smov 0  }
   0x7   :  { %s1096_s16 = smov 0   ;;  %s1098_s17 = smov 0  }
   0x8 LB: > { %s760_s18 = sadd.s32 4294967295, %s1051_s17   ;;  %s761_s19 = sadd.s32 4294967294, %s1051_s17   ;;  %s1051_s17 = sphi %s1098_s17, %s22_s17   ;;  %s1047_s16 = sphi %s1096_s16, %s1353_s16   ;;  %s1043_s15 = sphi %s1094_s15, %s1352_s15   ;;  %s1039_s14 = sphi %s1092_s14, %s1351_s14   ;;  %s1035_s13 = sphi %s1090_s13, %s1350_s13   ;;  %s1031_s12 = sphi %s1088_s12, %s1349_s12  }
   0x9   : > { %s41_s20 = sadd.s32 1, %s1047_s16  ;;  %s71_s21 = sadd.s32 1, %s1039_s14 }
   0xa   : > { %p43_p0 = scmp.ge.s32.totalorder %s41_s20, 2  ;;  %p78_p1 = scmp.ne.s32.totalorder %s1039_s14, %s1035_s13 }
   0xb   : > { %p79_p2 = scmp.eq.s32.totalorder %s1051_s17, 0  ;;  %p84_p3 = scmp.ne.s32.totalorder %s1035_s13, %s1031_s12 }
   0xc   : > { %s1355_s20 = smov (%p43_p0, %s41_s20), 0  ;;  %p85_p5 = scmp.eq.s32.totalorder %s760_s18, 0 }
   0xd   : > { %p1129_p4 = por %p79_p2, %p78_p1  ;;  %s66_s23 = ssub.s32 %s1047_s16, %s1355_s20 }
   0xe   : > { %p140_p6 = scmp.eq.s32.totalorder %s760_s18, 1  ;;  %p69_p7 = scmp.eq.s32.totalorder %s66_s23, 0 }
   0xf   : > { %p1135_p8 = por %p85_p5, %p84_p3  ;;  %p146_p10 = scmp.eq.s32.totalorder %s761_s19, 1 }
  0x10   : > { %p1139_p9 = por %p140_p6, %p78_p1  ;;  %p835_p13 = scmp.lt.s32.totalorder %s1051_s17, 2 }
  0x11   : > { %s1338_s24 = scalar_select %p1135_p8, 1, 0 }
  0x12   : > { %s1339_s25 = scalar_select %p1139_p9, 1, 0 }
  0x13   : > { %s1144_s26 = scalar_select %p69_p7, %s1039_s14, %s71_s21  }
  0x14   : > { %p1146_p11 = por %p146_p10, %p84_p3  ;;  %s1153_s28 = sand.u32 1, %s1039_s14  }
  0x15   : > { %s764_s29 = sshll.u32 %s1153_s28, 3  ;;  %s765_s30 = sshll.u32 %s1047_s16, 7 }
  0x16   : > { %s1340_s27 = scalar_select %p1146_p11, 1, 0 }
  0x17   : > { %s1160_s6 = scalar_lea.hbm %s1332_s1, %s765_s30  ;;  %s173_s7 = scalar_lea.vmem [#allocation2], %s764_s29 }
  0x18   : > { %s181_s8 = sshll.u32 %s173_s7, 4  ;;  %p1166_p0 = pnand %p835_p13, %p1129_p4  ;;  %s1162_s8 = int_to_ptr.vmem [resolvable:$true] %s181_s8 }
  0x19   : > { %s170_s10 = scalar_lea.sflag [#allocation3], %s1153_s28  ;;  %s905_s11 = scalar_lea.hbm %s1160_s6, 128 }
  0x1a   : > { %p906_p3 = scmp.ne.s32.totalorder %s1160_s6, %s905_s11  ;;  %p907_p5 = pneg %p1166_p0 }
  0x1b   : > { %s910_s21 = scalar_lea.hbm %s1332_s1, 256  ;;  %p911_p4 = scmp.lt.u32.totalorder %s1160_s6, %s1332_s1 }
  0x1c   : > { %p908_p6 = pnand %p907_p5, %p906_p3  ;;  %p912_p10 = scmp.lt.u32.totalorder %s910_s21, %s905_s11 }
  0x1d   : > { %p914_p12 = scmp.lt.u32.totalorder %s905_s11, %s1160_s6 }
  0x1e   : > { %p909_p7 = pneg %p908_p6  ;;  %p913_p13 = por %p912_p10, %p911_p4 }
  0x20   : > { %p915_p1 = por %p914_p12, %p913_p13 }
  0x22   : > { %p916_p2 = pnand %p915_p1, %p909_p7 }
  0x24   : > { %919 = shalt.err (!%p916_p2)
}
  0x25   : > { %s920_s29 = scalar_lea.vmem %s1162_s8, 128  ;;  %s1053_s30 = smov [#allocation2]  }
  0x26   : > { %p921_p3 = scmp.ne.s32.totalorder %s1162_s8, %s920_s29  ;;  %s925_s4 = sshll.u32 %s1053_s30, 4  ;;  %s926_s4 = int_to_ptr.vmem [resolvable:$false] %s925_s4 }
  0x27   : > { %s927_s5 = scalar_lea.vmem %s926_s4, 256  ;;  %p928_p9 = scmp.lt.s32.totalorder %s1162_s8, %s926_s4 }
  0x28   : > { %p923_p6 = pnand %p921_p3, %p907_p5  ;;  %p929_p4 = scmp.lt.s32.totalorder %s927_s5, %s920_s29 }
  0x2a   : > { %p924_p11 = pneg %p923_p6  ;;  %p930_p10 = por %p929_p4, %p928_p9 }
  0x2c   : > { %p931_p12 = pnand %p930_p10, %p924_p11 }
  0x2e   : > { %934 = shalt.err (!%p931_p12)
}
  0x2f   : > { %827 = dma.hbm_to_vmem [thread:$0]  (!%p1166_p0), %s1160_s6, 128, %s1162_s8, %s170_s10  }
  0x30   : > { %p1342_p1 = scmp.lt.s32.totalorder %s1051_s17, 3  ;;  %p1343_p2 = scmp.ge.s32.totalorder %s1051_s17, 1 }
  0x31   : > { %s766_s11 = sshll.u32 %s1153_s28, 4  ;;  %s789_s18 = sshll.u32 %s1047_s16, 8 }
  0x32   : > { %p1202_p7 = pnand %p1343_p2, %p1342_p1  ;;  %s1211_s22 = scalar_lea.hbm %s1333_s2, %s789_s18 }
  0x33   : > { %s192_s23 = scalar_lea.vmem [#allocation5], %s766_s11  ;;  %s189_s6 = scalar_lea.sflag [#allocation6], %s1153_s28 }
  0x34   : > { %s200_s29 = sshll.u32 %s192_s23, 4  ;;  %s935_s8 = scalar_lea.hbm %s1211_s22, 256  ;;  %s1213_s29 = int_to_ptr.vmem [resolvable:$true] %s200_s29 }
  0x35   : > { %p936_p9 = scmp.ne.s32.totalorder %s1211_s22, %s935_s8  ;;  %s940_s4 = scalar_lea.hbm %s1333_s2, 512 }
  0x36   : > { %p941_p3 = scmp.lt.u32.totalorder %s1211_s22, %s1333_s2  ;;  %p942_p6 = scmp.lt.u32.totalorder %s940_s4, %s935_s8 }
  0x37   : > { %p938_p11 = pnand %p936_p9, %p907_p5  ;;  %p944_p10 = scmp.lt.u32.totalorder %s935_s8, %s1211_s22 }
  0x38   : > { %p943_p4 = por %p942_p6, %p941_p3 }
  0x39   : > { %p939_p13 = pneg %p938_p11 }
  0x3a   : > { %p945_p12 = por %p944_p10, %p943_p4 }
  0x3c   : > { %p946_p1 = pnand %p945_p12, %p939_p13 }
  0x3e   : > { %949 = shalt.err (!%p946_p1)
}
  0x3f   : > { %s950_s11 = scalar_lea.vmem %s1213_s29, 256  ;;  %s1054_s19 = smov [#allocation5]  }
  0x40   : > { %p951_p2 = scmp.ne.s32.totalorder %s1213_s29, %s950_s11  ;;  %s955_s21 = sshll.u32 %s1054_s19, 4  ;;  %s956_s21 = int_to_ptr.vmem [resolvable:$false] %s955_s21 }
  0x41   : > { %s957_s23 = scalar_lea.vmem %s956_s21, 512  ;;  %p958_p8 = scmp.lt.s32.totalorder %s1213_s29, %s956_s21 }
  0x42   : > { %p953_p9 = pnand %p951_p2, %p907_p5  ;;  %p959_p3 = scmp.lt.s32.totalorder %s957_s23, %s950_s11 }
  0x44   : > { %p954_p11 = pneg %p953_p9  ;;  %p960_p6 = por %p959_p3, %p958_p8 }
  0x46   : > { %p961_p4 = pnand %p960_p6, %p954_p11 }
  0x48   : > { %964 = shalt.err (!%p961_p4)
}
  0x49   : > { %s1055_s8 = smov 128   ;;  %s1056_s10 = smov 8  }
  0x4a   : > { %830 = dma.hbm_to_vmem [thread:$0]  (!%p1166_p0), %s1211_s22, 256, %s1213_s29, %s189_s6, %s1055_s8, %s1055_s8, %s1056_s10  }
  0x4b   : > { %212 = sbr.rel (%p1202_p7) target bundleno = 463 (0x1cf), region = 32  ;;  %s1244_s30 = sand.u32 (!%p1202_p7), 1, %s1035_s13  }
  0x4c   : > { %s770_s4 = sshll.u32 (!%p1202_p7), %s1244_s30, 3  ;;  %s215_s5 = scalar_lea.sflag (!%p1202_p7), [#allocation3], %s1244_s30 }
  0x4d   : > { %s218_s18 = scalar_lea.vmem (!%p1202_p7), [#allocation2], %s770_s4  ;;  %p1345_p8 = scmp.ne.s32.totalorder (!%p1202_p7), %s1338_s24, 0 }
  0x52   : > { %1018 = dma.done.wait (%p1345_p8), %s215_s5, 128  }
  0x53   : > { %1020 = vsyncadd (%p1345_p8), %s215_s5, 4294967168  ;;  %s771_s28 = sshll.u32 %s1244_s30, 4  ;;  %s224_s9 = scalar_lea.sflag [#allocation6], %s1244_s30 }
  0x54   : > { %s1256_s7 = scalar_lea.vmem [#allocation5], %s771_s28 }
  0x55   : > { %1022 = dma.done.wait (%p1345_p8), %s224_s9, 256  }
  0x56   : > { %1024 = vsyncadd (%p1345_p8), %s224_s9, 4294967040  ;;  %v1057_v0 = vmov 0.0   ;;  %vm1058_vm0 = vmmov 0   ;;  %v1059_v1 = vmov 8   ;;  %v1060_v2 = vmov 0   ;;  %v255_v3 = vld [vmem:[%s218_s18] sm:$0xff] }
  0x57   : > { %798 = vmatprep.subr.mxu0 %v1057_v0  ;;  %803 = vmatprep.subr.mxu1 %v1057_v0  ;;  %vm342_vm1 = vcmask 1045504   ;;  %v256_v4 = vld [vmem:[%s1256_s7] sm:$0xff]  ;;  %vm266_vm2 = vcmask 1042432   ;;  %s1061_s22 = smov 127   ;;  %s1062_s24 = smov 121   ;;  %v1063_v6 = vmov 12   ;;  %v579_v16 = vlaneseq }
  0x58   : > { %800 = vmatprep.mubr.msk.f32.mxu0 %vm1058_vm0, %v1057_v0  ;;  %805 = vmatprep.mubr.msk.f32.mxu1 %vm1058_vm0, %v1057_v0  ;;  %v262_v5 = vrot.slane %v256_v4, 3  ;;  %v781_v7 = vld [vmem:[%s1331_s0] ss:$0 sm:$0xff]  ;;  %v783_v8 = vld [vmem:[%s1331_s0 + $0x1] ss:$0 sm:$0xff]  ;;  %v417_v10 = vrot.slane %v256_v4, 6 }
  0x59   : > { %897 = vset.pattern.permute.xlu1 %v1059_v1  ;;  %899 = vset.pattern.permute.xlu0 %v1060_v2  ;;  %v257_v9 = vld [vmem:[%s1256_s7 + $0x8] sm:$0xff]  ;;  %vm416_vm3 = vcmask 1041408   ;;  %vm263_vm4 = vcmask 23552   ;;  %vm339_vm5 = vcmask 48128   ;;  %vm423_vm6 = vcmask 1043456   ;;  %s254_s21 = scalar_lea.vmem [#allocation7], %s771_s28 }
  0x5a   : > { %259 = vrot.lane.b32.xlu0 %v255_v3, %s1061_s22  ;;  %804 = vmatpush3.msk.msra.mxu1 %vm342_vm1, %v256_v4  ;;  %v418_v11 = vrot.slane %v257_v9, 6  ;;  %v498_v12 = vrot.slane %v257_v9, 2  ;;  %vm502_vm7 = vcmask 1044480   ;;  %vm420_vm8 = vcmask 31744   ;;  %s648_s23 = sshll.u32 %s254_s21, 4  ;;  %s786_s8 = sshll.u32 %s1043_s15, 7  ;;  %s1277_s23 = int_to_ptr.vmem [resolvable:$true] %s648_s23 }
  0x5b   : > { %813 = vmatprep.subr.mxu1 %v1057_v0  ;;  %576 = vperm.xlu1 %897, %v255_v3   ;;  %vm499_vm9 = vcmask 39936   ;;  %v580_v17 = vshrl.u32 %v579_v16, 7  ;;  %s1282_s5 = scalar_lea.hbm %s1334_s3, %s786_s8  ;;  %s634_s15 = scalar_lea.sflag [#allocation4], %s1244_s30 }
  0x5c   : > { %799 = vmatpush3.msk.msra.mxu0 %vm266_vm2, %v262_v5  ;;  %v419_v13 = vsel %vm416_vm3, %v417_v10, %v418_v11  ;;  %s965_s18 = scalar_lea.vmem %s1277_s23, 256  ;;  %p1346_p5 = scmp.ne.s32.totalorder %s1339_s25, 0 }
  0x5d   : > { %808 = vmatprep.subr.mxu0 %v1057_v0  ;;  %v581_v18 = vsub.s32 7, %v580_v17  ;;  %p966_p0 = scmp.ne.s32.totalorder %s1277_s23, %s965_s18  ;;  %s1064_s28 = smov [#allocation7]  }
  0x5e   : > { %496 = vrot.lane.b32.xlu0 %v255_v3, %s1062_s24  ;;  %s969_s9 = sshll.u32 %s1064_s28, 4  ;;  %s970_s9 = int_to_ptr.vmem [resolvable:$false] %s969_s9 }
  0x5f   : > { %898 = vset.pattern.permute.xlu1 %v1063_v6  ;;  %v582_v19 = vrot.slane %v257_v9, %v581_v18  ;;  %p967_p7 = pnand %p966_p0, %p1346_p5  ;;  %s971_s7 = scalar_lea.vmem %s970_s9, 512 }
  0x60   : > { %601 = vperm.xlu1 %898, %v255_v3   ;;  %p972_p10 = scmp.lt.s32.totalorder %s1277_s23, %s970_s9  ;;  %p973_p12 = scmp.lt.s32.totalorder %s971_s7, %s965_s18 }
  0x61   : > { %p968_p13 = pneg %p967_p7 }
  0x62   : > { %614 = vperm.xlu0 %899, %v781_v7   ;;  %p974_p1 = por %p973_p12, %p972_p10 }
  0x64   : > { %900 = vset.pattern.permute.xlu1 %v1060_v2  ;;  %p975_p2 = pnand %p974_p1, %p968_p13 }
  0x65   : > { %627 = vperm.xlu1 %900, %v783_v8  }
  0xcc   : > { %v260_v14 = vpop.permute.xlu0 %259 }
  0xcd   : > { %801 = vmatmul.mubr.msk.f32.vlgmr.msra.gmra.mrb[0].mxu0 %vm263_vm4, %v260_v14  ;;  %806 = vmatmul.mubr.msk.f32.vlgmr.msra.gmra.mrb[0].mxu1 %vm339_vm5, %v260_v14 }
  0xce   : > { %809 = vmatpush3.msk.msra.mxu0 %vm423_vm6, %v419_v13  ;;  %814 = vmatpush3.msk.msra.mxu1 %vm502_vm7, %v498_v12 }
  0xcf   : > { %810 = vmatprep.mubr.msk.f32.mxu0 %vm1058_vm0, %v1057_v0  ;;  %815 = vmatprep.mubr.msk.f32.mxu1 %vm1058_vm0, %v1057_v0 }
  0xd0   : > { %v497_v15 = vpop.permute.xlu0 %496 }
  0xd1   : > { %811 = vmatmul.mubr.msk.f32.vlgmr.msra.gmra.mrb[2].mxu0 %vm420_vm8, %v255_v3  ;;  %816 = vmatmul.mubr.msk.f32.vlgmr.msra.gmra.mrb[2].mxu1 %vm499_vm9, %v497_v15 }
  0xda   : > { %v577_v20 = vpop.permute.xlu1 %576 }
  0xdb   : > { %v583_v21 = vmul.f32 %v582_v19, %v577_v20 }
  0xdf   : > { %v602_v39 = vpop.permute.xlu1 %601 }
  0xe1   : > { %v615_v47 = vpop.permute.xlu0 %614 }
  0xe4   : > { %v628_v46 = vpop.permute.xlu1 %627 }
 0x1a0   : > { %v335_v22 = vpop.f32.mrb[0].mxu0  ;;  %v411_v23 = vpop.f32.mrb[0].mxu1 }
 0x1a1   : > { %v584_v24 = vmul.f32 %v335_v22, %v335_v22  ;;  %v802_v25 = vpop.f32.mrb[1].mxu0  ;;  %v807_v26 = vpop.f32.mrb[1].mxu1  ;;  %v586_v36 = vand.u32 2147483647, %v411_v23 }
 0x1a3   : > { %v585_v27 = vsub.f32 %v583_v21, %v584_v24 }
 0x1a4   : > { %v492_v28 = vpop.f32.mrb[2].mxu0  ;;  %v571_v29 = vpop.f32.mrb[2].mxu1 }
 0x1a5   : > { %v587_v30 = vmax.f32 %v585_v27, 1e-12  ;;  %v590_v31 = vmul.f32 %v492_v28, %v492_v28  ;;  %v812_v32 = vpop.f32.mrb[3].mxu0  ;;  %v817_v33 = vpop.f32.mrb[3].mxu1  ;;  %vm605_vm12 = vcmp.lt.f32.partialorder %v585_v27, 1e-12 }
 0x1a7   : > { %901 = vrsqrt.f32 %v587_v30  ;;  %v591_v34 = vsub.f32 %v571_v29, %v590_v31 }
 0x1a9   : > { %v592_v35 = vmax.f32 %v591_v34, 0.0 }
 0x1ab   : > { %903 = vrsqrt.f32 %v592_v35  ;;  %vm595_vm10 = vcmp.eq.f32.partialorder %v592_v35, inf  ;;  %v598_v42 = vand.u32 2147483648, %v592_v35  ;;  %vm597_vm11 = vcmp.eq.f32.partialorder %v592_v35, 0.0 }
 0x1b1   : > { %v902_v37 = vpop.eup %901 }
 0x1b2   : > { %v589_v38 = vmul.f32 %v902_v37, %v586_v36 }
 0x1b5   : > { %v904_v40 = vpop.eup %903 }
 0x1b6   : > { %v594_v41 = vmul.f32 %v904_v40, %v592_v35 }
 0x1b8   : > { %v596_v43 = vsel %vm595_vm10, %v592_v35, %v594_v41 }
 0x1b9   : > { %v599_v44 = vsel %vm597_vm11, %v598_v42, %v596_v43 }
 0x1ba   : > { %v604_v45 = vmul.f32 %v602_v39, %v599_v44 }
 0x1bc   : > { %v606_v48 = vsel %vm605_vm12, %v604_v45, %v589_v38 }
 0x1bd   : > { %v630_v49 = vmul.f32 %v628_v46, %v606_v48  ;;  %v617_v50 = vmul.f32 %v615_v47, %v606_v48 }
 0x1bf   : > { %784 = vst [vmem:[%s254_s21 + $0x8] sm:$0xff] %v630_v49  ;;  %618 = vst [vmem:[%s254_s21] sm:$0xff] %v617_v50 }
 0x1c0   : > { %978 = shalt.err (!%p975_p2)
}
 0x1c1   : > { %s979_s22 = scalar_lea.hbm %s1282_s5, 256  ;;  %s983_s6 = scalar_lea.hbm %s1334_s3, 512 }
 0x1c2   : > { %p980_p9 = scmp.ne.s32.totalorder %s1282_s5, %s979_s22  ;;  %p984_p6 = scmp.lt.u32.totalorder %s1282_s5, %s1334_s3 }
 0x1c3   : > { %p985_p4 = scmp.lt.u32.totalorder %s983_s6, %s979_s22  ;;  %p987_p0 = scmp.lt.u32.totalorder %s979_s22, %s1282_s5 }
 0x1c4   : > { %p981_p11 = pnand %p980_p9, %p1346_p5 }
 0x1c5   : > { %p986_p8 = por %p985_p4, %p984_p6 }
 0x1c6   : > { %p982_p3 = pneg %p981_p11 }
 0x1c7   : > { %p988_p7 = por %p987_p0, %p986_p8 }
 0x1c9   : > { %p989_p13 = pnand %p988_p7, %p982_p3 }
 0x1cb   : > { %992 = shalt.err (!%p989_p13)
}
 0x1cc   : > { %s1065_s21 = smov 128   ;;  %s1066_s8 = smov 256  }
 0x1cd   : > { %s1067_s10 = smov 8  }
 0x1ce   : > { %822 = dma.vmem_to_hbm [thread:$0]  (%p1346_p5), %s1277_s23, 256, %s1282_s5, %s634_s15, %s1065_s21, %s1066_s8, %s1067_s10  }
 0x1cf PF: > { %s663_s4 = sand.u32 1, %s1031_s12   ;;  %p1347_p10 = scmp.ne.s32.totalorder %s1340_s27, 0 }
 0x1d0   : > { %p1348_p12 = scmp.ge.s32.totalorder %s1051_s17, 2  ;;  %s664_s18 = scalar_lea.sflag [#allocation4], %s663_s4 }
 0x1d2   : > { %p832_p1 = pnand %p1348_p12, %p1347_p10 }
 0x1d4   : > { %1026 = dma.done.wait (!%p832_p1), %s664_s18, 256  }
 0x1d5   : > { %1028 = vsyncadd (!%p832_p1), %s664_s18, 4294967040  ;;  %s22_s17 = sadd.s32 1, %s1051_s17   ;;  %s1349_s12 = smov %s1035_s13 }
 0x1d6   : > { %p19_p2 = scmp.ge.s32.totalorder %s22_s17, 4   ;;  %s1350_s13 = smov %s1039_s14 }
 0x1d7   : > { %s1351_s14 = smov %s1144_s26  ;;  %s1352_s15 = smov %s1047_s16 }
 0x1d8   : > { %s1353_s16 = smov %s1355_s20  ;;  %21 = sbr.rel (!%p19_p2) target bundleno = 8 (0x8), region = 92 }
 0x1df   :  { %669 = vsyncpa [#allocation3], 1 }
 0x1e0   :  { %671 = vsyncpa [#allocation3 + $0x1], 1 }
 0x1e1   :  { %672 = vsyncpa [#allocation6], 1 }
 0x1e2   :  { %674 = vsyncpa [#allocation6 + $0x1], 1 }
 0x1e3   :  { %675 = vsyncpa [#allocation4], 1 }
 0x1e4   :  { %677 = vsyncpa [#allocation4 + $0x1], 1 }

</bundles_post_ra>
